<compile_context>
chip_gen: v6e
topology: v6e:2x2x1
jax: 0.10.0
libtpu: 0.0.40
codegen_flags: <defaults>
</compile_context>

<pallas_src>
import functools

import jax
import jax.numpy as jnp
from jax.experimental import pallas as pl
from jax.experimental.pallas import tpu as pltpu

_LANE = 128     # vreg lane width (last dim)
_SUBLANE = 8    # f32 sublane count (second-to-last dim)


def _round_up(x: int, m: int) -> int:
    return ((x + m - 1) // m) * m


def _fused_mlp_kernel(*refs, num_layers: int):
    """Fused MLP. refs = (x, w0, b0, w1, b1, ..., w_{L-1}, b_{L-1}, out).

    x:   (TB, D0_pad)        f32
    w_i: (Di_pad, Di+1_pad)  bf16
    b_i: (1, Di+1_pad)       f32
    out: (TB, DL_pad)        f32
    """
    x_ref = refs[0]
    o_ref = refs[-1]
    wb = refs[1:-1]

    x = x_ref[...]                                    # f32 activation tile
    for li in range(num_layers):                      # unrolled in Python
        w = wb[2 * li][...]                           # bf16 weight tile (resident)
        b = wb[2 * li + 1][...]                       # f32 bias, broadcasts over batch
        acc = jnp.dot(x.astype(jnp.bfloat16), w,
                      preferred_element_type=jnp.float32)
        acc = acc + b
        if li < num_layers - 1:                       # no activation on output layer
            acc = jnp.maximum(acc, 0.0)
        x = acc
    o_ref[...] = x.astype(o_ref.dtype)


def mlp_simple_forward(params, x, *, batch_tile: int = 512):
    """MLPSimple.forward via a single fused pallas_call.

    params: list of (w, b) with w shaped (in_features, out_features) [already
            transposed relative to nn.Linear.weight], f32.
    x:      (B, input_dim) f32.
    """
    B, Din = x.shape
    num_layers = len(params)
    dims = [Din] + [w.shape[1] for (w, _) in params]
    dims_pad = [_round_up(d, _LANE) for d in dims]

    # Batch tiling (sublane aligned); pad batch so the grid divides evenly.
    TB = _round_up(min(batch_tile, _round_up(B, _SUBLANE)), _SUBLANE)
    B_pad = _round_up(B, TB)
    grid = (B_pad // TB,)

    # Zero-pad the activation to (B_pad, D0_pad).
    x_pad = jnp.zeros((B_pad, dims_pad[0]), jnp.float32)
    x_pad = x_pad.at[:B, :Din].set(x.astype(jnp.float32))

    flat_inputs = [x_pad]
    in_specs = [pl.BlockSpec((TB, dims_pad[0]), lambda i: (i, 0))]
    for li, (w, b) in enumerate(params):
        dip, dop = dims_pad[li], dims_pad[li + 1]
        w_pad = jnp.zeros((dip, dop), jnp.bfloat16)
        w_pad = w_pad.at[:w.shape[0], :w.shape[1]].set(w.astype(jnp.bfloat16))
        b_pad = jnp.zeros((1, dop), jnp.float32)
        b_pad = b_pad.at[0, :b.shape[0]].set(b.astype(jnp.float32))
        flat_inputs += [w_pad, b_pad]
        # Weights/biases resident across all batch tiles (constant index map).
        in_specs += [pl.BlockSpec((dip, dop), lambda i: (0, 0)),
                     pl.BlockSpec((1, dop), lambda i: (0, 0))]

    out_spec = pl.BlockSpec((TB, dims_pad[-1]), lambda i: (i, 0))

    # Advisory cost estimate so XLA schedules around the custom call.
    flops = 2 * B_pad * sum(dims_pad[i] * dims_pad[i + 1]
                            for i in range(num_layers))
    param_bytes = sum(int(a.size) * a.dtype.itemsize for a in flat_inputs[1:])
    bytes_accessed = (int(x_pad.size) * 4 + B_pad * dims_pad[-1] * 4
                      + param_bytes)

    # VMEM budget: double-buffered activation tiles + resident params, plus
    # headroom for intermediate hidden activations; cap at 32 MiB.
    hidden_bytes = TB * max(dims_pad) * 4
    vmem_bytes = (2 * (TB * dims_pad[0] + TB * dims_pad[-1]) * 4
                  + 2 * param_bytes + 2 * hidden_bytes)
    vmem_limit = int(min(max(4 * vmem_bytes, 8 << 20), 32 << 20))

    kernel = functools.partial(_fused_mlp_kernel, num_layers=num_layers)
    out_pad = pl.pallas_call(
        kernel,
        out_shape=jax.ShapeDtypeStruct((B_pad, dims_pad[-1]), jnp.float32),
        grid=grid,
        in_specs=in_specs,
        out_specs=out_spec,
        compiler_params=pltpu.CompilerParams(
            dimension_semantics=("parallel",),   # independent batch tiles
            vmem_limit_bytes=vmem_limit,
        ),
        cost_estimate=pl.CostEstimate(
            flops=flops, transcendentals=0, bytes_accessed=bytes_accessed),
    )(*flat_inputs)

    return out_pad[:B, :dims[-1]]


def init_mlp_params(key, input_dim, output_dim, hidden_dim, depth):
    """PyTorch-like uniform init; weights stored transposed as (in, out), f32."""
    params = []
    dims = [(input_dim, hidden_dim)] + [(hidden_dim, hidden_dim)] * depth + [
        (hidden_dim, output_dim)
    ]
    for din, dout in dims:
        key, kw, kb = jax.random.split(key, 3)
        bound = 1.0 / jnp.sqrt(jnp.float32(din))
        w = jax.random.uniform(kw, (din, dout), jnp.float32, -bound, bound)
        b = jax.random.uniform(kb, (dout,), jnp.float32, -bound, bound)
        params.append((w, b))
    return params


if __name__ == "__main__":
    input_dim, output_dim, hidden_dim, depth = 16, 8, 32, 2
    batch = 8

    key = jax.random.PRNGKey(0)
    key, kx = jax.random.split(key)
    x = jax.random.normal(kx, (batch, input_dim), dtype=jnp.float32)

    params = init_mlp_params(key, input_dim, output_dim, hidden_dim, depth)

    fwd = jax.jit(mlp_simple_forward)
    out = jax.block_until_ready(fwd(params, x))
    assert out.shape == (batch, output_dim)

    n = len(params)

    # Tight check vs a reference using the same bf16-matmul / f32-accumulate math.
    ref = x
    for li, (w, b) in enumerate(params):
        acc = jnp.dot(ref.astype(jnp.bfloat16), w.astype(jnp.bfloat16),
                      preferred_element_type=jnp.float32) + b
        if li < n - 1:
            acc = jnp.maximum(acc, 0.0)
        ref = acc
    assert jnp.allclose(out, ref, atol=1e-4, rtol=1e-4)

    # Loose check vs the pure-f32 PyTorch-equivalent math (bf16 matmul error bound).
    ref32 = x
    for li, (w, b) in enumerate(params):
        acc = ref32 @ w + b
        if li < n - 1:
            acc = jnp.maximum(acc, 0.0)
        ref32 = acc
    assert jnp.allclose(out, ref32, atol=5e-2, rtol=5e-2)

    print("KERNEL_OK")
</pallas_src>

<mosaic_0001>
module attributes {stable_mosaic.version = 11 : i64} {
  func.func @_fused_mlp_kernel(%arg0: i32, %arg1: memref<8x128xf32, #tpu.memory_space<vmem>>, %arg2: memref<128x128xbf16, #tpu.memory_space<vmem>>, %arg3: memref<1x128xf32, #tpu.memory_space<vmem>>, %arg4: memref<128x128xbf16, #tpu.memory_space<vmem>>, %arg5: memref<1x128xf32, #tpu.memory_space<vmem>>, %arg6: memref<128x128xbf16, #tpu.memory_space<vmem>>, %arg7: memref<1x128xf32, #tpu.memory_space<vmem>>, %arg8: memref<128x128xbf16, #tpu.memory_space<vmem>>, %arg9: memref<1x128xf32, #tpu.memory_space<vmem>>, %arg10: memref<8x128xf32, #tpu.memory_space<vmem>>) attributes {dimension_semantics = [#tpu.dimension_semantics<parallel>], iteration_bounds = array<i64: 1>, scalar_prefetch = 0 : i64, scratch_operands = 0 : i64, tpu.core_type = #tpu.core_type<tc>, window_params = [{transform_indices = @transform_0, window_bounds = array<i64: 8, 128>}, {pipeline_mode = #tpu.pipeline_mode<synchronous>, transform_indices = @transform_1, window_bounds = array<i64: 128, 128>}, {pipeline_mode = #tpu.pipeline_mode<synchronous>, transform_indices = @transform_2, window_bounds = array<i64: 1, 128>}, {pipeline_mode = #tpu.pipeline_mode<synchronous>, transform_indices = @transform_3, window_bounds = array<i64: 128, 128>}, {pipeline_mode = #tpu.pipeline_mode<synchronous>, transform_indices = @transform_4, window_bounds = array<i64: 1, 128>}, {pipeline_mode = #tpu.pipeline_mode<synchronous>, transform_indices = @transform_5, window_bounds = array<i64: 128, 128>}, {pipeline_mode = #tpu.pipeline_mode<synchronous>, transform_indices = @transform_6, window_bounds = array<i64: 1, 128>}, {pipeline_mode = #tpu.pipeline_mode<synchronous>, transform_indices = @transform_7, window_bounds = array<i64: 128, 128>}, {pipeline_mode = #tpu.pipeline_mode<synchronous>, transform_indices = @transform_8, window_bounds = array<i64: 1, 128>}, {transform_indices = @transform_9, window_bounds = array<i64: 8, 128>}]} {
    %c0 = arith.constant 0 : index
    %c0_0 = arith.constant 0 : index
    %0 = vector.load %arg1[%c0, %c0_0] : memref<8x128xf32, #tpu.memory_space<vmem>>, vector<8x128xf32>
    %c0_1 = arith.constant 0 : index
    %c0_2 = arith.constant 0 : index
    %1 = vector.load %arg2[%c0_1, %c0_2] : memref<128x128xbf16, #tpu.memory_space<vmem>>, vector<128x128xbf16>
    %c0_3 = arith.constant 0 : index
    %c0_4 = arith.constant 0 : index
    %2 = vector.load %arg3[%c0_3, %c0_4] : memref<1x128xf32, #tpu.memory_space<vmem>>, vector<1x128xf32>
    %3 = arith.truncf %0 : vector<8x128xf32> to vector<8x128xbf16>
    %cst = arith.constant dense<0.000000e+00> : vector<8x128xf32>
    %4 = tpu.matmul %3, %1, %cst {dimension_numbers = #tpu.dot_dimension_numbers<[1], [0], [0], [1], [0, 0, 1, 1], [], []>} : vector<8x128xbf16>, vector<128x128xbf16>, vector<8x128xf32> -> vector<8x128xf32>
    %5 = vector.broadcast %2 : vector<1x128xf32> to vector<8x128xf32>
    %6 = arith.addf %4, %5 : vector<8x128xf32>
    %cst_5 = arith.constant 0.000000e+00 : f32
    %7 = vector.broadcast %cst_5 : f32 to vector<8x128xf32>
    %8 = arith.maximumf %6, %7 : vector<8x128xf32>
    %c0_6 = arith.constant 0 : index
    %c0_7 = arith.constant 0 : index
    %9 = vector.load %arg4[%c0_6, %c0_7] : memref<128x128xbf16, #tpu.memory_space<vmem>>, vector<128x128xbf16>
    %c0_8 = arith.constant 0 : index
    %c0_9 = arith.constant 0 : index
    %10 = vector.load %arg5[%c0_8, %c0_9] : memref<1x128xf32, #tpu.memory_space<vmem>>, vector<1x128xf32>
    %11 = arith.truncf %8 : vector<8x128xf32> to vector<8x128xbf16>
    %cst_10 = arith.constant dense<0.000000e+00> : vector<8x128xf32>
    %12 = tpu.matmul %11, %9, %cst_10 {dimension_numbers = #tpu.dot_dimension_numbers<[1], [0], [0], [1], [0, 0, 1, 1], [], []>} : vector<8x128xbf16>, vector<128x128xbf16>, vector<8x128xf32> -> vector<8x128xf32>
    %13 = vector.broadcast %10 : vector<1x128xf32> to vector<8x128xf32>
    %14 = arith.addf %12, %13 : vector<8x128xf32>
    %cst_11 = arith.constant 0.000000e+00 : f32
    %15 = vector.broadcast %cst_11 : f32 to vector<8x128xf32>
    %16 = arith.maximumf %14, %15 : vector<8x128xf32>
    %c0_12 = arith.constant 0 : index
    %c0_13 = arith.constant 0 : index
    %17 = vector.load %arg6[%c0_12, %c0_13] : memref<128x128xbf16, #tpu.memory_space<vmem>>, vector<128x128xbf16>
    %c0_14 = arith.constant 0 : index
    %c0_15 = arith.constant 0 : index
    %18 = vector.load %arg7[%c0_14, %c0_15] : memref<1x128xf32, #tpu.memory_space<vmem>>, vector<1x128xf32>
    %19 = arith.truncf %16 : vector<8x128xf32> to vector<8x128xbf16>
    %cst_16 = arith.constant dense<0.000000e+00> : vector<8x128xf32>
    %20 = tpu.matmul %19, %17, %cst_16 {dimension_numbers = #tpu.dot_dimension_numbers<[1], [0], [0], [1], [0, 0, 1, 1], [], []>} : vector<8x128xbf16>, vector<128x128xbf16>, vector<8x128xf32> -> vector<8x128xf32>
    %21 = vector.broadcast %18 : vector<1x128xf32> to vector<8x128xf32>
    %22 = arith.addf %20, %21 : vector<8x128xf32>
    %cst_17 = arith.constant 0.000000e+00 : f32
    %23 = vector.broadcast %cst_17 : f32 to vector<8x128xf32>
    %24 = arith.maximumf %22, %23 : vector<8x128xf32>
    %c0_18 = arith.constant 0 : index
    %c0_19 = arith.constant 0 : index
    %25 = vector.load %arg8[%c0_18, %c0_19] : memref<128x128xbf16, #tpu.memory_space<vmem>>, vector<128x128xbf16>
    %c0_20 = arith.constant 0 : index
    %c0_21 = arith.constant 0 : index
    %26 = vector.load %arg9[%c0_20, %c0_21] : memref<1x128xf32, #tpu.memory_space<vmem>>, vector<1x128xf32>
    %27 = arith.truncf %24 : vector<8x128xf32> to vector<8x128xbf16>
    %cst_22 = arith.constant dense<0.000000e+00> : vector<8x128xf32>
    %28 = tpu.matmul %27, %25, %cst_22 {dimension_numbers = #tpu.dot_dimension_numbers<[1], [0], [0], [1], [0, 0, 1, 1], [], []>} : vector<8x128xbf16>, vector<128x128xbf16>, vector<8x128xf32> -> vector<8x128xf32>
    %29 = vector.broadcast %26 : vector<1x128xf32> to vector<8x128xf32>
    %30 = arith.addf %28, %29 : vector<8x128xf32>
    %c0_23 = arith.constant 0 : index
    %c0_24 = arith.constant 0 : index
    %31 = vector.load %arg10[%c0_23, %c0_24] : memref<8x128xf32, #tpu.memory_space<vmem>>, vector<8x128xf32>
    tpu.vector_store %arg10[%c0_23, %c0_24], %30 {strides = array<i32>} : memref<8x128xf32, #tpu.memory_space<vmem>>, vector<8x128xf32>,
    return
  }
  func.func @transform_0(%arg0: i32) -> (i32, i32) {
    %c0_i32 = arith.constant 0 : i32
    %c0_i32_0 = arith.constant 0 : i32
    return %arg0, %c0_i32 : i32, i32
  }
  func.func @transform_1(%arg0: i32) -> (i32, i32) {
    %c0_i32 = arith.constant 0 : i32
    %c0_i32_0 = arith.constant 0 : i32
    %c0_i32_1 = arith.constant 0 : i32
    return %c0_i32, %c0_i32_0 : i32, i32
  }
  func.func @transform_2(%arg0: i32) -> (i32, i32) {
    %c0_i32 = arith.constant 0 : i32
    %c0_i32_0 = arith.constant 0 : i32
    %c0_i32_1 = arith.constant 0 : i32
    return %c0_i32, %c0_i32_0 : i32, i32
  }
  func.func @transform_3(%arg0: i32) -> (i32, i32) {
    %c0_i32 = arith.constant 0 : i32
    %c0_i32_0 = arith.constant 0 : i32
    %c0_i32_1 = arith.constant 0 : i32
    return %c0_i32, %c0_i32_0 : i32, i32
  }
  func.func @transform_4(%arg0: i32) -> (i32, i32) {
    %c0_i32 = arith.constant 0 : i32
    %c0_i32_0 = arith.constant 0 : i32
    %c0_i32_1 = arith.constant 0 : i32
    return %c0_i32, %c0_i32_0 : i32, i32
  }
  func.func @transform_5(%arg0: i32) -> (i32, i32) {
    %c0_i32 = arith.constant 0 : i32
    %c0_i32_0 = arith.constant 0 : i32
    %c0_i32_1 = arith.constant 0 : i32
    return %c0_i32, %c0_i32_0 : i32, i32
  }
  func.func @transform_6(%arg0: i32) -> (i32, i32) {
    %c0_i32 = arith.constant 0 : i32
    %c0_i32_0 = arith.constant 0 : i32
    %c0_i32_1 = arith.constant 0 : i32
    return %c0_i32, %c0_i32_0 : i32, i32
  }
  func.func @transform_7(%arg0: i32) -> (i32, i32) {
    %c0_i32 = arith.constant 0 : i32
    %c0_i32_0 = arith.constant 0 : i32
    %c0_i32_1 = arith.constant 0 : i32
    return %c0_i32, %c0_i32_0 : i32, i32
  }
  func.func @transform_8(%arg0: i32) -> (i32, i32) {
    %c0_i32 = arith.constant 0 : i32
    %c0_i32_0 = arith.constant 0 : i32
    %c0_i32_1 = arith.constant 0 : i32
    return %c0_i32, %c0_i32_0 : i32, i32
  }
  func.func @transform_9(%arg0: i32) -> (i32, i32) {
    %c0_i32 = arith.constant 0 : i32
    %c0_i32_0 = arith.constant 0 : i32
    return %arg0, %c0_i32 : i32, i32
  }
}

</mosaic_0001>

<bundles_post_ra>
// kernel: mlp_simple_forward.1
= control target key start
LH: loop header
LB: loop body
LE: loop exit
PB: predicated region body
PF: predicated region fallthrough
CT: control target
= control target key end

     0   :  { %v710_v1 = vmov 0.0   ;;  %vm711_vm0 = vmmov 0   ;;  %s917_s0 = inlined_call_operand.vmem [shape: f32[8,128], index: 0, kind: input, shape index: {}]   ;;  %s918_s1 = inlined_call_operand.vmem [shape: bf16[128,128], index: 1, kind: input, shape index: {}]   ;;  %s919_s2 = inlined_call_operand.vmem [shape: f32[1,128], index: 2, kind: input, shape index: {}]   ;;  %s920_s3 = inlined_call_operand.vmem [shape: bf16[128,128], index: 3, kind: input, shape index: {}]   ;;  %s921_s4 = inlined_call_operand.vmem [shape: f32[1,128], index: 4, kind: input, shape index: {}]   ;;  %s922_s5 = inlined_call_operand.vmem [shape: bf16[128,128], index: 5, kind: input, shape index: {}]   ;;  %s923_s6 = inlined_call_operand.vmem [shape: f32[1,128], index: 6, kind: input, shape index: {}]   ;;  %s924_s7 = inlined_call_operand.vmem [shape: bf16[128,128], index: 7, kind: input, shape index: {}]   ;;  %s925_s8 = inlined_call_operand.vmem [shape: f32[1,128], index: 8, kind: input, shape index: {}]   ;;  %s926_s9 = inlined_call_operand.hbm [shape: f32[8,128], index: 9, kind: output, shape index: {}]  }
   0x1   :  { %v656_v0 = vld [vmem:[%s918_s1 + $0x38] sm:$0xff]   ;;  %573 = vmatprep.subr.bf16.mxu0 %v710_v1  ;;  %593 = vmatprep.subr.bf16.mxu1 %v710_v1  ;;  %v657_v2 = vld [vmem:[%s918_s1 + $0x30] sm:$0xff]   ;;  %v658_v3 = vld [vmem:[%s918_s1 + $0x28] sm:$0xff]  }
   0x2   :  { %574 = vmatpush3.bf16.msra.mxu0 %v656_v0  ;;  %589 = vmatprep.mubr.msk.bf16.mxu0 %vm711_vm0, %v710_v1  ;;  %v664_v4 = vld [vmem:[%s920_s3 + $0x38] sm:$0xff]   ;;  %v659_v5 = vld [vmem:[%s918_s1 + $0x20] sm:$0xff]   ;;  %v665_v6 = vld [vmem:[%s920_s3 + $0x30] sm:$0xff]  }
   0x3   :  { %575 = vmatprep.subr.bf16.mxu0 %v710_v1  ;;  %609 = vmatprep.mubr.msk.bf16.mxu1 %vm711_vm0, %v710_v1  ;;  %v660_v7 = vld [vmem:[%s918_s1 + $0x18] sm:$0xff]   ;;  %v666_v8 = vld [vmem:[%s920_s3 + $0x28] sm:$0xff]   ;;  %v661_v9 = vld [vmem:[%s918_s1 + $0x10] sm:$0xff]  }
   0x4   :  { %594 = vmatpush3.bf16.msra.mxu1 %v664_v4  ;;  %v667_v10 = vld [vmem:[%s920_s3 + $0x20] sm:$0xff]   ;;  %v662_v11 = vld [vmem:[%s918_s1 + $0x8] sm:$0xff]   ;;  %v668_v12 = vld [vmem:[%s920_s3 + $0x18] sm:$0xff]  }
   0x5   :  { %595 = vmatprep.subr.bf16.mxu1 %v710_v1  ;;  %v663_v13 = vld [vmem:[%s918_s1] sm:$0xff]  }
   0x6   :  { %576 = vmatpush3.bf16.msra.mxu0 %v657_v2  ;;  %v34_v14 = vld [vmem:[%s917_s0] sm:$0xff] }
   0x7   :  { %577 = vmatprep.subr.bf16.mxu0 %v710_v1 }
   0x8   :  { %596 = vmatpush3.bf16.msra.mxu1 %v665_v6 }
   0x9   :  { %597 = vmatprep.subr.bf16.mxu1 %v710_v1 }
   0xa   :  { %578 = vmatpush3.bf16.msra.mxu0 %v658_v3 }
   0xb   :  { %579 = vmatprep.subr.bf16.mxu0 %v710_v1 }
   0xc   :  { %598 = vmatpush3.bf16.msra.mxu1 %v666_v8 }
   0xd   :  { %599 = vmatprep.subr.bf16.mxu1 %v710_v1 }
   0xe   :  { %580 = vmatpush3.bf16.msra.mxu0 %v659_v5 }
   0xf   :  { %581 = vmatprep.subr.bf16.mxu0 %v710_v1 }
  0x10   :  { %600 = vmatpush3.bf16.msra.mxu1 %v667_v10 }
  0x11   :  { %601 = vmatprep.subr.bf16.mxu1 %v710_v1 }
  0x12   :  { %582 = vmatpush3.bf16.msra.mxu0 %v660_v7 }
  0x13   :  { %583 = vmatprep.subr.bf16.mxu0 %v710_v1 }
  0x16   :  { %584 = vmatpush3.bf16.msra.mxu0 %v661_v9 }
  0x17   :  { %585 = vmatprep.subr.bf16.mxu0 %v710_v1 }
  0x1a   :  { %586 = vmatpush3.bf16.msra.mxu0 %v662_v11 }
  0x1b   :  { %14 = vsyncpa [#allocation3], 0  ;;  %587 = vmatprep.subr.bf16.mxu0 %v710_v1  ;;  %602 = vmatpush3.bf16.msra.mxu1 %v668_v12  ;;  %v669_v15 = vld [vmem:[%s920_s3 + $0x10] sm:$0xff]   ;;  %v52_v16 = vpack.c.bf16 %v34_v14, %v34_v14  ;;  %v670_v17 = vld [vmem:[%s920_s3 + $0x8] sm:$0xff]   ;;  %s712_s11 = smov [#allocation2]  }
  0x1c   :  { %603 = vmatprep.subr.bf16.mxu1 %v710_v1  ;;  %v671_v18 = vld [vmem:[%s920_s3] sm:$0xff]   ;;  %v672_v19 = vld [vmem:[%s922_s5 + $0x38] sm:$0xff]   ;;  %v673_v20 = vld [vmem:[%s922_s5 + $0x30] sm:$0xff]   ;;  %s493_s12 = sshll.u32 %s712_s11, 4  ;;  %s494_s12 = int_to_ptr.vmem [resolvable:$true] %s493_s12 }
  0x1d   :  { %v674_v21 = vld [vmem:[%s922_s5 + $0x28] sm:$0xff]   ;;  %v675_v22 = vld [vmem:[%s922_s5 + $0x20] sm:$0xff]   ;;  %v676_v23 = vld [vmem:[%s922_s5 + $0x18] sm:$0xff]   ;;  %p693_p1 = scmp.lt.s32.totalorder %s494_s12, %s494_s12 }
  0x1e   :  { %588 = vmatpush3.bf16.msra.mxu0 %v663_v13  ;;  %v677_v24 = vld [vmem:[%s922_s5 + $0x10] sm:$0xff]   ;;  %v501_v25 = vld [vmem:[%s919_s2] ss:$0 sm:$0xff]  ;;  %v678_v33 = vld [vmem:[%s922_s5 + $0x8] sm:$0xff]  }
  0x1f   :  { %604 = vmatpush3.bf16.msra.mxu1 %v669_v15  ;;  %613 = vmatprep.subr.bf16.mxu0 %v710_v1  ;;  %v679_v34 = vld [vmem:[%s922_s5] sm:$0xff]   ;;  %v680_v35 = vld [vmem:[%s924_s7 + $0x38] sm:$0xff]   ;;  %v681_v36 = vld [vmem:[%s924_s7 + $0x30] sm:$0xff]  }
  0x20   :  { %605 = vmatprep.subr.bf16.mxu1 %v710_v1  ;;  %v682_v37 = vld [vmem:[%s924_s7 + $0x28] sm:$0xff]   ;;  %v683_v38 = vld [vmem:[%s924_s7 + $0x20] sm:$0xff]   ;;  %v684_v39 = vld [vmem:[%s924_s7 + $0x18] sm:$0xff]  }
  0x21   :  { %590 = vmatmul.mubr.bf16.vlgmr.msra.gmra.mxu0 %v52_v16  ;;  %v685_v40 = vld [vmem:[%s924_s7 + $0x10] sm:$0xff]   ;;  %v510_v41 = vld [vmem:[%s921_s4] ss:$0 sm:$0xff]  ;;  %v686_v49 = vld [vmem:[%s924_s7 + $0x8] sm:$0xff]  }
  0x22   :  { %629 = vmatprep.mubr.msk.bf16.mxu0 %vm711_vm0, %v710_v1  ;;  %614 = vmatpush3.bf16.msra.mxu0 %v672_v19  ;;  %v687_v50 = vld [vmem:[%s924_s7] sm:$0xff]  }
  0x23   :  { %606 = vmatpush3.bf16.msra.mxu1 %v670_v17  ;;  %615 = vmatprep.subr.bf16.mxu0 %v710_v1  ;;  %v519_v51 = vld [vmem:[%s923_s6] ss:$0 sm:$0xff]  ;;  %s688_s6 = scalar_lea.vmem %s494_s12, 128 }
  0x24   :  { %607 = vmatprep.subr.bf16.mxu1 %v710_v1  ;;  %v528_v59 = vld [vmem:[%s925_s8] ss:$0 sm:$0xff]  ;;  %p689_p0 = scmp.ne.s32.totalorder %s494_s12, %s688_s6  ;;  %p694_p2 = scmp.lt.s32.totalorder %s688_s6, %s688_s6 }
  0x26   :  { %616 = vmatpush3.bf16.msra.mxu0 %v673_v20  ;;  %p695_p3 = por %p694_p2, %p693_p1 }
  0x27   :  { %608 = vmatpush3.bf16.msra.mxu1 %v671_v18  ;;  %617 = vmatprep.subr.bf16.mxu0 %v710_v1 }
  0x28   :  { %633 = vmatprep.subr.bf16.mxu1 %v710_v1  ;;  %p696_p4 = pnand %p695_p3, %p689_p0 }
  0x2a   :  { %618 = vmatpush3.bf16.msra.mxu0 %v674_v21 }
  0x2b   :  { %619 = vmatprep.subr.bf16.mxu0 %v710_v1 }
  0x2e   :  { %620 = vmatpush3.bf16.msra.mxu0 %v675_v22 }
  0x2f   :  { %621 = vmatprep.subr.bf16.mxu0 %v710_v1 }
  0x32   :  { %622 = vmatpush3.bf16.msra.mxu0 %v676_v23 }
  0x33   :  { %623 = vmatprep.subr.bf16.mxu0 %v710_v1 }
  0x36   :  { %624 = vmatpush3.bf16.msra.mxu0 %v677_v24 }
  0x37   :  { %625 = vmatprep.subr.bf16.mxu0 %v710_v1 }
  0x3a   :  { %626 = vmatpush3.bf16.msra.mxu0 %v678_v33 }
  0x3b   :  { %627 = vmatprep.subr.bf16.mxu0 %v710_v1 }
  0x3e   :  { %628 = vmatpush3.bf16.msra.mxu0 %v679_v34 }
  0xe1   :  { %v141_v26 = vpop.f32.mrf.mxu0 }
  0xe2   :  { %v142_v27 = vadd.f32 %v501_v25, %v141_v26 }
  0xe3   :  { %v591_v28 = vpop.f32.mrf.mxu0 }
  0xe4   :  { %v147_v29 = vmax.f32 %v142_v27, 0.0 }
  0xe5   :  { %v144_v30 = vpop.f32.mrf.mxu0 }
  0xe6   :  { %v165_v31 = vpack.c.bf16 %v147_v29, %v147_v29 }
  0xe7   :  { %v592_v32 = vpop.f32.mrf.mxu0 }
  0xe8   :  { %610 = vmatmul.mubr.bf16.vlgmr.msra.gmra.mxu1 %v165_v31 }
  0xe9   :  { %649 = vmatprep.mubr.msk.bf16.mxu1 %vm711_vm0, %v710_v1  ;;  %634 = vmatpush3.bf16.msra.mxu1 %v680_v35 }
  0xea   :  { %635 = vmatprep.subr.bf16.mxu1 %v710_v1 }
  0xed   :  { %636 = vmatpush3.bf16.msra.mxu1 %v681_v36 }
  0xee   :  { %637 = vmatprep.subr.bf16.mxu1 %v710_v1 }
  0xf1   :  { %638 = vmatpush3.bf16.msra.mxu1 %v682_v37 }
  0xf2   :  { %639 = vmatprep.subr.bf16.mxu1 %v710_v1 }
  0xf5   :  { %640 = vmatpush3.bf16.msra.mxu1 %v683_v38 }
  0xf6   :  { %641 = vmatprep.subr.bf16.mxu1 %v710_v1 }
  0xf9   :  { %642 = vmatpush3.bf16.msra.mxu1 %v684_v39 }
  0xfa   :  { %643 = vmatprep.subr.bf16.mxu1 %v710_v1 }
  0xfd   :  { %644 = vmatpush3.bf16.msra.mxu1 %v685_v40 }
  0xfe   :  { %645 = vmatprep.subr.bf16.mxu1 %v710_v1 }
 0x101   :  { %646 = vmatpush3.bf16.msra.mxu1 %v686_v49 }
 0x102   :  { %647 = vmatprep.subr.bf16.mxu1 %v710_v1 }
 0x105   :  { %648 = vmatpush3.bf16.msra.mxu1 %v687_v50 }
 0x1a8   :  { %v254_v42 = vpop.f32.mrf.mxu1 }
 0x1a9   :  { %v255_v43 = vadd.f32 %v510_v41, %v254_v42 }
 0x1aa   :  { %v611_v44 = vpop.f32.mrf.mxu1 }
 0x1ab   :  { %v260_v45 = vmax.f32 %v255_v43, 0.0 }
 0x1ac   :  { %v257_v46 = vpop.f32.mrf.mxu1 }
 0x1ad   :  { %v278_v47 = vpack.c.bf16 %v260_v45, %v260_v45 }
 0x1ae   :  { %v612_v48 = vpop.f32.mrf.mxu1 }
 0x1af   :  { %630 = vmatmul.mubr.bf16.vlgmr.msra.gmra.mxu0 %v278_v47 }
 0x26f   :  { %v367_v52 = vpop.f32.mrf.mxu0 }
 0x270   :  { %v368_v53 = vadd.f32 %v519_v51, %v367_v52 }
 0x271   :  { %v631_v54 = vpop.f32.mrf.mxu0 }
 0x272   :  { %v373_v55 = vmax.f32 %v368_v53, 0.0 }
 0x273   :  { %v370_v56 = vpop.f32.mrf.mxu0 }
 0x274   :  { %v391_v57 = vpack.c.bf16 %v373_v55, %v373_v55 }
 0x275   :  { %v632_v58 = vpop.f32.mrf.mxu0 }
 0x276   :  { %650 = vmatmul.mubr.bf16.vlgmr.msra.gmra.mxu1 %v391_v57 }
 0x336   :  { %v480_v60 = vpop.f32.mrf.mxu1 }
 0x337   :  { %v481_v61 = vadd.f32 %v528_v59, %v480_v60 }
 0x338   :  { %v651_v62 = vpop.f32.mrf.mxu1 }
 0x339   :  { %486 = vst [vmem:[#allocation2] sm:$0xff] %v481_v61 }
 0x33a   :  { %v483_v63 = vpop.f32.mrf.mxu1 }
 0x33b   :  { %699 = shalt.err (!%p696_p4)
}
 0x33c   :  { %496 = dma.vmem_to_hbm [thread:$0]  %s494_s12, 128, %s926_s9, [#allocation3]   ;;  %v652_v0 = vpop.f32.mrf.mxu1 }
 0x33d   :  { %708 = dma.done.wait [#allocation3], 128  }
 0x33e   :  { %709 = vsyncadd [#allocation3], 4294967168 }
 0x33f   :  { %500 = vsyncpa [#allocation3], 1 }

</bundles_post_ra>
